<compile_context>
chip_gen: v6e
topology: v6e:2x2x1
jax: 0.10.0
libtpu: 0.0.40
codegen_flags: <defaults>
</compile_context>

<pallas_src>
import jax
import jax.numpy as jnp
from jax.experimental import pallas as pl
from jax.experimental.pallas import tpu as pltpu


def lnp_kernel(x_ref, w_ref, o_ref):
    # x_ref: (C, tm, HW)  activations for one (batch, T-tile), all channels
    # w_ref: (C, HW, tn)  flattened spatial filters for one N-tile (bf16)
    # o_ref: (tm, tn)     output tile (f32)
    C = x_ref.shape[0]
    acc = jnp.zeros(o_ref.shape, jnp.float32)
    # Short, fully unrolled channel loop; each step is one MXU matmul
    # (tm, HW) @ (HW, tn) with f32 accumulation.
    for c in range(C):
        acc = acc + jnp.dot(
            x_ref[c].astype(jnp.bfloat16),
            w_ref[c],
            preferred_element_type=jnp.float32,
        )
    # exp only after the full (C, H, W) reduction is complete.
    o_ref[...] = jnp.exp(acc).astype(o_ref.dtype)


def _pick_tn(n_neurons):
    """Pad N to a multiple of 128; use 256-wide tiles only on v6e/v7x and only
    when it does not inflate the padding (v5e's MXU is 4x128x128, so 256 gives
    no benefit there)."""
    n_pad = ((n_neurons + 127) // 128) * 128
    try:
        kind = jax.devices()[0].device_kind.lower()
    except Exception:  # pragma: no cover - defensive; default is correct everywhere
        kind = ""
    is_v5e = ("v5 lite" in kind) or ("v5e" in kind) or ("v5litepod" in kind)
    if (not is_v5e) and (n_pad % 256 == 0):
        return 256, n_pad
    return 128, n_pad


def lnp_forward(x, conv_weight, *, tm=None, tn=None):
    """x: (B, C, T, H, W) float32 or bfloat16; conv_weight: (N, C, 1, H, W).

    Returns (B, T, N) float32 = exp(full-field inner product per neuron).
    """
    B, C, T, H, W = x.shape
    N = conv_weight.shape[0]
    HW = H * W
    x_bytes = jnp.dtype(x.dtype).itemsize

    # ---- neuron tiling (lane-dense, padding-minimizing) ---------------------
    if tn is None:
        tn, n_pad = _pick_tn(N)
    else:
        n_pad = ((N + tn - 1) // tn) * tn

    # ---- T tiling ------------------------------------------------------------
    # The x block is now (C, tm, HW): size it so the double-buffered block stays
    # within ~24 MiB (12 MiB per buffer), which together with the weight block,
    # the output tile and headroom fits v7x's 64 MiB VMEM with room to spare.
    mult = 16 if x_bytes == 2 else 8  # bf16 min tile is (16, 128)
    if tm is None:
        per_buf_budget = 12 * 1024 * 1024
        tm_cap = per_buf_budget // max(1, C * HW * x_bytes)
        tm_cap = max(mult, (tm_cap // mult) * mult)
        tm = min(1024, tm_cap)
    if tm >= T:
        tm = T  # block equal to the full dim is always legal
    else:
        tm = max(mult, (tm // mult) * mult)

    # ---- data plumbing (no activation copy) ----------------------------------
    # Contiguous merge of (H, W) -> free reshape; x is read from HBM exactly
    # once per (batch, T-tile) by the kernel.
    x_r = x.reshape(B, C, T, HW)

    # Weight is tiny (C*HW*N): reshape/transpose/pad/cast once in the wrapper.
    w_r = jnp.transpose(conv_weight.reshape(N, C, HW), (1, 2, 0))    # (C, HW, N)
    w_r = jnp.pad(w_r, ((0, 0), (0, 0), (0, n_pad - N)))
    w_r = w_r.astype(jnp.bfloat16)                                   # (C, HW, n_pad)

    grid = (B, pl.cdiv(T, tm), n_pad // tn)

    # ---- VMEM budget (derived from actual tile bytes, valid on v5e/v6e/v7x) --
    x_block_bytes = C * tm * HW * x_bytes
    w_block_bytes = C * HW * tn * 2
    o_block_bytes = tm * tn * 4
    needed = 2 * (x_block_bytes + w_block_bytes + o_block_bytes)
    vmem_limit = int(min(48 * 1024 * 1024,
                         max(32 * 1024 * 1024, needed + (8 << 20))))

    cost = pl.CostEstimate(
        flops=2 * B * T * n_pad * C * HW,
        transcendentals=B * T * n_pad,
        bytes_accessed=x_r.size * x_bytes + w_r.size * 2 + B * T * n_pad * 4,
    )

    out = pl.pallas_call(
        lnp_kernel,
        out_shape=jax.ShapeDtypeStruct((B, T, n_pad), jnp.float32),
        grid=grid,
        in_specs=[
            # x_r: (B, C, T, HW) -> kernel sees (C, tm, HW).  Block index does
            # NOT depend on j, so the tile stays resident across N-tiles.
            pl.BlockSpec((None, C, tm, HW), lambda b, i, j: (b, 0, i, 0)),
            # w_r: (C, HW, n_pad) -> kernel sees (C, HW, tn); one DMA per N-tile.
            pl.BlockSpec((C, HW, tn), lambda b, i, j: (0, 0, j)),
        ],
        # out: (B, T, n_pad) -> kernel sees (tm, tn)
        out_specs=pl.BlockSpec((None, tm, tn), lambda b, i, j: (b, i, j)),
        compiler_params=pltpu.CompilerParams(
            dimension_semantics=("parallel", "parallel", "parallel"),
            vmem_limit_bytes=vmem_limit,
        ),
        cost_estimate=cost,
    )(x_r, w_r)

    # Drop zero-padded neuron columns (they hold exp(0)=1) only if any exist.
    if n_pad != N:
        out = out[:, :, :N]
    return out


def make_lnp_weight(key, in_shape, outdims):
    """Deterministic xavier_normal_ init of the Conv3d weight.

    Conv3d weight shape: (outdims, C, 1, H, W).
    fan_in = C*1*H*W, fan_out = outdims*1*H*W, std = sqrt(2/(fan_in+fan_out)).
    """
    C, _, H, W = in_shape
    fan_in = C * 1 * H * W
    fan_out = outdims * 1 * H * W
    std = (2.0 / (fan_in + fan_out)) ** 0.5
    return std * jax.random.normal(key, (outdims, C, 1, H, W), dtype=jnp.float32)


# TODO(synk): regularizer() / laplace() / weights_l1() are training-time loss
# terms, not part of the forward pass; they are not implemented as kernels.

if __name__ == "__main__":
    key = jax.random.PRNGKey(0)
    k_x, k_w = jax.random.split(key)

    # Small shapes consistent with the module: in_shape = (C, T, H, W)
    B, C, T, H, W = 2, 4, 8, 16, 16
    outdims = 32
    in_shape = (C, T, H, W)

    x = jax.random.normal(k_x, (B, C, T, H, W), dtype=jnp.float32)
    w = make_lnp_weight(k_w, in_shape, outdims)

    out = jax.block_until_ready(lnp_forward(x, w))

    # Reference check in plain JAX (same math as the PyTorch Conv3d + exp).
    # Tolerance relaxed because the MXU is fed bf16 (accumulation stays f32).
    ref = jnp.exp(
        jnp.einsum("bcthw,nchw->btn", x, w.reshape(outdims, C, H, W))
    )
    assert out.shape == (B, T, outdims), out.shape
    assert jnp.allclose(out, ref, rtol=2e-2, atol=1e-2), "mismatch vs reference"

    print("KERNEL_OK")
</pallas_src>

<mosaic_0001>
module attributes {stable_mosaic.version = 11 : i64} {
  func.func @lnp_kernel(%arg0: i32, %arg1: i32, %arg2: i32, %arg3: memref<1x4x8x256xf32, #tpu.memory_space<vmem>>, %arg4: memref<4x256x128xbf16, #tpu.memory_space<vmem>>, %arg5: memref<1x8x128xf32, #tpu.memory_space<vmem>>) attributes {dimension_semantics = [#tpu.dimension_semantics<parallel>, #tpu.dimension_semantics<parallel>, #tpu.dimension_semantics<parallel>], iteration_bounds = array<i64: 2, 1, 1>, scalar_prefetch = 0 : i64, scratch_operands = 0 : i64, tpu.core_type = #tpu.core_type<tc>, window_params = [{transform_indices = @transform_0, window_bounds = array<i64: 1, 4, 8, 256>}, {transform_indices = @transform_1, window_bounds = array<i64: 4, 256, 128>}, {transform_indices = @transform_2, window_bounds = array<i64: 1, 8, 128>}]} {
    %cst = arith.constant 0.000000e+00 : f32
    %0 = vector.broadcast %cst : f32 to vector<8x128xf32>
    %c0 = arith.constant 0 : index
    %c0_0 = arith.constant 0 : index
    %c0_1 = arith.constant 0 : index
    %c0_2 = arith.constant 0 : index
    %1 = vector.load %arg3[%c0, %c0_0, %c0_1, %c0_2] : memref<1x4x8x256xf32, #tpu.memory_space<vmem>>, vector<1x1x8x256xf32>
    %2 = vector.shape_cast %1 : vector<1x1x8x256xf32> to vector<8x256xf32>
    %3 = arith.truncf %2 : vector<8x256xf32> to vector<8x256xbf16>
    %c0_3 = arith.constant 0 : index
    %c0_4 = arith.constant 0 : index
    %c0_5 = arith.constant 0 : index
    %4 = vector.load %arg4[%c0_3, %c0_4, %c0_5] : memref<4x256x128xbf16, #tpu.memory_space<vmem>>, vector<1x256x128xbf16>
    %5 = vector.shape_cast %4 : vector<1x256x128xbf16> to vector<256x128xbf16>
    %cst_6 = arith.constant dense<0.000000e+00> : vector<8x128xf32>
    %6 = tpu.matmul %3, %5, %cst_6 {dimension_numbers = #tpu.dot_dimension_numbers<[1], [0], [0], [1], [0, 0, 1, 1], [], []>} : vector<8x256xbf16>, vector<256x128xbf16>, vector<8x128xf32> -> vector<8x128xf32>
    %7 = arith.addf %0, %6 : vector<8x128xf32>
    %c0_7 = arith.constant 0 : index
    %c1 = arith.constant 1 : index
    %c0_8 = arith.constant 0 : index
    %c0_9 = arith.constant 0 : index
    %8 = vector.load %arg3[%c0_7, %c1, %c0_8, %c0_9] : memref<1x4x8x256xf32, #tpu.memory_space<vmem>>, vector<1x1x8x256xf32>
    %9 = vector.shape_cast %8 : vector<1x1x8x256xf32> to vector<8x256xf32>
    %10 = arith.truncf %9 : vector<8x256xf32> to vector<8x256xbf16>
    %c1_10 = arith.constant 1 : index
    %c0_11 = arith.constant 0 : index
    %c0_12 = arith.constant 0 : index
    %11 = vector.load %arg4[%c1_10, %c0_11, %c0_12] : memref<4x256x128xbf16, #tpu.memory_space<vmem>>, vector<1x256x128xbf16>
    %12 = vector.shape_cast %11 : vector<1x256x128xbf16> to vector<256x128xbf16>
    %cst_13 = arith.constant dense<0.000000e+00> : vector<8x128xf32>
    %13 = tpu.matmul %10, %12, %cst_13 {dimension_numbers = #tpu.dot_dimension_numbers<[1], [0], [0], [1], [0, 0, 1, 1], [], []>} : vector<8x256xbf16>, vector<256x128xbf16>, vector<8x128xf32> -> vector<8x128xf32>
    %14 = arith.addf %7, %13 : vector<8x128xf32>
    %c0_14 = arith.constant 0 : index
    %c2 = arith.constant 2 : index
    %c0_15 = arith.constant 0 : index
    %c0_16 = arith.constant 0 : index
    %15 = vector.load %arg3[%c0_14, %c2, %c0_15, %c0_16] : memref<1x4x8x256xf32, #tpu.memory_space<vmem>>, vector<1x1x8x256xf32>
    %16 = vector.shape_cast %15 : vector<1x1x8x256xf32> to vector<8x256xf32>
    %17 = arith.truncf %16 : vector<8x256xf32> to vector<8x256xbf16>
    %c2_17 = arith.constant 2 : index
    %c0_18 = arith.constant 0 : index
    %c0_19 = arith.constant 0 : index
    %18 = vector.load %arg4[%c2_17, %c0_18, %c0_19] : memref<4x256x128xbf16, #tpu.memory_space<vmem>>, vector<1x256x128xbf16>
    %19 = vector.shape_cast %18 : vector<1x256x128xbf16> to vector<256x128xbf16>
    %cst_20 = arith.constant dense<0.000000e+00> : vector<8x128xf32>
    %20 = tpu.matmul %17, %19, %cst_20 {dimension_numbers = #tpu.dot_dimension_numbers<[1], [0], [0], [1], [0, 0, 1, 1], [], []>} : vector<8x256xbf16>, vector<256x128xbf16>, vector<8x128xf32> -> vector<8x128xf32>
    %21 = arith.addf %14, %20 : vector<8x128xf32>
    %c0_21 = arith.constant 0 : index
    %c3 = arith.constant 3 : index
    %c0_22 = arith.constant 0 : index
    %c0_23 = arith.constant 0 : index
    %22 = vector.load %arg3[%c0_21, %c3, %c0_22, %c0_23] : memref<1x4x8x256xf32, #tpu.memory_space<vmem>>, vector<1x1x8x256xf32>
    %23 = vector.shape_cast %22 : vector<1x1x8x256xf32> to vector<8x256xf32>
    %24 = arith.truncf %23 : vector<8x256xf32> to vector<8x256xbf16>
    %c3_24 = arith.constant 3 : index
    %c0_25 = arith.constant 0 : index
    %c0_26 = arith.constant 0 : index
    %25 = vector.load %arg4[%c3_24, %c0_25, %c0_26] : memref<4x256x128xbf16, #tpu.memory_space<vmem>>, vector<1x256x128xbf16>
    %26 = vector.shape_cast %25 : vector<1x256x128xbf16> to vector<256x128xbf16>
    %cst_27 = arith.constant dense<0.000000e+00> : vector<8x128xf32>
    %27 = tpu.matmul %24, %26, %cst_27 {dimension_numbers = #tpu.dot_dimension_numbers<[1], [0], [0], [1], [0, 0, 1, 1], [], []>} : vector<8x256xbf16>, vector<256x128xbf16>, vector<8x128xf32> -> vector<8x128xf32>
    %28 = arith.addf %21, %27 : vector<8x128xf32>
    %29 = math.exp %28 : vector<8x128xf32>
    %c0_28 = arith.constant 0 : index
    %c0_29 = arith.constant 0 : index
    %c0_30 = arith.constant 0 : index
    %30 = vector.load %arg5[%c0_28, %c0_29, %c0_30] : memref<1x8x128xf32, #tpu.memory_space<vmem>>, vector<1x8x128xf32>
    %31 = vector.shape_cast %30 : vector<1x8x128xf32> to vector<8x128xf32>
    %32 = vector.shape_cast %29 : vector<8x128xf32> to vector<1x8x128xf32>
    tpu.vector_store %arg5[%c0_28, %c0_29, %c0_30], %32 {strides = array<i32>} : memref<1x8x128xf32, #tpu.memory_space<vmem>>, vector<1x8x128xf32>,
    return
  }
  func.func @transform_0(%arg0: i32, %arg1: i32, %arg2: i32) -> (i32, i32, i32, i32) {
    %c0_i32 = arith.constant 0 : i32
    %c0_i32_0 = arith.constant 0 : i32
    %c0_i32_1 = arith.constant 0 : i32
    return %arg0, %c0_i32, %arg1, %c0_i32_0 : i32, i32, i32, i32
  }
  func.func @transform_1(%arg0: i32, %arg1: i32, %arg2: i32) -> (i32, i32, i32) {
    %c0_i32 = arith.constant 0 : i32
    %c0_i32_0 = arith.constant 0 : i32
    %c0_i32_1 = arith.constant 0 : i32
    return %c0_i32, %c0_i32_0, %arg2 : i32, i32, i32
  }
  func.func @transform_2(%arg0: i32, %arg1: i32, %arg2: i32) -> (i32, i32, i32) {
    %c0_i32 = arith.constant 0 : i32
    return %arg0, %arg1, %arg2 : i32, i32, i32
  }
}

</mosaic_0001>

<bundles_post_ra>
// kernel: tpu_custom_call.1
= control target key start
LH: loop header
LB: loop body
LE: loop exit
PB: predicated region body
PF: predicated region fallthrough
CT: control target
= control target key end

     0   :  { %7 = vsyncpa [#allocation3], 0  ;;  %s1689_s0 = inlined_call_operand.hbm [shape: f32[2,4,8,256], index: 0, kind: input, shape index: {}]   ;;  %s1690_s1 = inlined_call_operand.hbm [shape: bf16[4,256,128], index: 1, kind: input, shape index: {}]   ;;  %s1691_s2 = inlined_call_operand.hbm [shape: f32[2,8,128], index: 2, kind: output, shape index: {}]  }
   0x1   :  { %9 = vsyncpa [#allocation3 + $0x1], 0 }
   0x2   :  { %10 = vsyncpa [#allocation6], 0 }
   0x3   :  { %11 = vsyncpa [#allocation4], 0 }
   0x4   :  { %13 = vsyncpa [#allocation4 + $0x1], 0  ;;  %s1505_s9 = smov 0   ;;  %s1507_s10 = smov 0  }
   0x5   :  { %s1509_s11 = smov 0   ;;  %s1511_s12 = smov 0  }
   0x6   :  { %s1513_s13 = smov 0   ;;  %s1515_s14 = smov 0  }
   0x7 LB: > { %s1025_s15 = sadd.s32 4294967295, %s1481_s14   ;;  %s1026_s16 = sadd.s32 4294967294, %s1481_s14   ;;  %s1481_s14 = sphi %s1515_s14, %s19_s14   ;;  %s1477_s13 = sphi %s1513_s13, %s1709_s13   ;;  %s1473_s12 = sphi %s1511_s12, %s1708_s12   ;;  %s1469_s11 = sphi %s1509_s11, %s1707_s11   ;;  %s1465_s10 = sphi %s1507_s10, %s1706_s10   ;;  %s1461_s9 = sphi %s1505_s9, %s1705_s9  }
   0x8   : > { %p60_p0 = scmp.ne.s32.totalorder %s1465_s10, %s1461_s9  ;;  %p1539_p1 = scmp.eq.s32.totalorder %s1025_s15, 0 }
   0x9   : > { %p1543_p2 = scmp.eq.s32.totalorder %s1025_s15, 1  ;;  %p120_p3 = scmp.eq.s32.totalorder %s1026_s16, 1 }
   0xa   : > { %p1549_p4 = por %p1539_p1, %p60_p0  ;;  %p1027_p5 = scmp.ge.s32.totalorder %s1481_s14, 1 }
   0xb   : > { %p1554_p6 = por %p120_p3, %p60_p0  ;;  %p127_p7 = scmp.lt.s32.totalorder %s1481_s14, 3 }
   0xc   : > { %s1695_s19 = scalar_select %p1549_p4, 1, 0 }
   0xd   : > { %s1696_s20 = scalar_select %p1554_p6, 1, 0 }
   0xe   : > { %p1559_p8 = pnand %p1027_p5, %p127_p7  ;;  %s1483_s22 = smov [#allocation5]  }
   0xf   : > { %s141_s23 = sshll.u32 %s1483_s22, 4  ;;  %s38_s25 = sadd.s32 1, %s1477_s13  ;;  %s142_s23 = int_to_ptr.vmem [resolvable:$true] %s141_s23 }
  0x10   : > { %p1208_p9 = pneg %p1559_p8  ;;  %s1354_s26 = scalar_lea.vmem %s142_s23, 8192 }
  0x11   : > { %p1355_p13 = scmp.ne.s32.totalorder %s142_s23, %s1354_s26  ;;  %p1362_p5 = scmp.lt.s32.totalorder %s142_s23, %s142_s23 }
  0x12   : > { %p1568_p11 = pnand %p1208_p9, %p1539_p1  ;;  %p1363_p7 = scmp.lt.s32.totalorder %s1354_s26, %s1354_s26 }
  0x14   : > { %p1345_p12 = pneg %p1568_p11  ;;  %p1364_p6 = por %p1363_p7, %p1362_p5 }
  0x16   : > { %p1357_p0 = pnand %p1355_p13, %p1345_p12 }
  0x18   : > { %p1358_p3 = pneg %p1357_p0 }
  0x1a   : > { %p1365_p4 = pnand %p1364_p6, %p1358_p3 }
  0x1c   : > { %1368 = shalt.err (!%p1365_p4)
}
  0x1d   : > { %s1484_s27 = smov 64   ;;  %s1485_s28 = smov 4  }
  0x1e   : > { %1211 = dma.hbm_to_vmem [thread:$0]  (!%p1568_p11), %s1690_s1, 8192, %s142_s23, [#allocation6], %s1484_s27, %s1484_s27, %s1485_s28  }
  0x1f   : > { %p40_p6 = scmp.ge.s32.totalorder %s38_s25, 2  ;;  %s47_s3 = sadd.s32 1, %s1469_s11 }
  0x20   : > { %p54_p4 = scmp.ne.s32.totalorder %s1469_s11, %s1465_s10  ;;  %p55_p9 = scmp.eq.s32.totalorder %s1481_s14, 0 }
  0x21   : > { %s1711_s25 = smov (%p40_p6, %s38_s25), 0  ;;  %p1221_p0 = scmp.lt.s32.totalorder %s1481_s14, 2 }
  0x22   : > { %p1586_p12 = por %p55_p9, %p54_p4  ;;  %p1592_p13 = por %p1543_p2, %p54_p4 }
  0x23   : > { %s42_s6 = ssub.s32 %s1477_s13, %s1711_s25  ;;  %s155_s7 = sand.u32 1, %s1469_s11  }
  0x24   : > { %p45_p11 = scmp.eq.s32.totalorder %s42_s6, 0  ;;  %s1030_s8 = sshll.u32 %s155_s7, 6 }
  0x25   : > { %s1111_s16 = sshll.u32 %s1477_s13, 10  ;;  %s159_s26 = scalar_lea.vmem [#allocation2], %s1030_s8 }
  0x26   : > { %s1601_s15 = scalar_select %p45_p11, %s1469_s11, %s47_s3  }
  0x27   : > { %s167_s24 = scalar_lea.hbm %s1689_s0, %s1111_s16  ;;  %s168_s27 = sshll.u32 %s159_s26, 4  ;;  %s169_s27 = int_to_ptr.vmem [resolvable:$true] %s168_s27 }
  0x28   : > { %p1609_p2 = pnand %p1221_p0, %p1586_p12  ;;  %s156_s28 = scalar_lea.sflag [#allocation3], %s155_s7 }
  0x29   : > { %s1382_s29 = scalar_lea.vmem %s169_s27, 1024  ;;  %s1486_s30 = smov [#allocation2]  }
  0x2a   : > { %p1371_p3 = pneg %p1609_p2  ;;  %p1383_p5 = scmp.ne.s32.totalorder %s169_s27, %s1382_s29 }
  0x2b   : > { %s1387_s3 = sshll.u32 %s1486_s30, 4  ;;  %s1388_s3 = int_to_ptr.vmem [resolvable:$false] %s1387_s3 }
  0x2c   : > { %p1385_p7 = pnand %p1383_p5, %p1371_p3  ;;  %s1389_s6 = scalar_lea.vmem %s1388_s3, 2048 }
  0x2d   : > { %p1390_p4 = scmp.lt.s32.totalorder %s169_s27, %s1388_s3  ;;  %p1391_p9 = scmp.lt.s32.totalorder %s1389_s6, %s1382_s29 }
  0x2e   : > { %p1386_p6 = pneg %p1385_p7 }
  0x2f   : > { %p1392_p11 = por %p1391_p9, %p1390_p4 }
  0x31   : > { %p1393_p10 = pnand %p1392_p11, %p1386_p6 }
  0x33   : > { %1396 = shalt.err (!%p1393_p10)
}
  0x34   : > { %s1487_s4 = smov 256   ;;  %s1488_s8 = smov 16  }
  0x35   : > { %1215 = dma.hbm_to_vmem [thread:$0]  (!%p1609_p2), %s167_s24, 1024, %s169_s27, %s156_s28, %s1487_s4, %s1487_s4, %s1488_s8  }
  0x36   : > { %180 = sbr.rel (%p1559_p8) target bundleno = 358 (0x166), region = 28  ;;  %s1620_s7 = sand.u32 (!%p1559_p8), 1, %s1465_s10  }
  0x37   : > { %s1034_s16 = sshll.u32 (!%p1559_p8), %s1620_s7, 6  ;;  %s183_s22 = scalar_lea.sflag (!%p1559_p8), [#allocation3], %s1620_s7 }
  0x38   : > { %s1624_s23 = scalar_lea.vmem (!%p1559_p8), [#allocation2], %s1034_s16  ;;  %p1702_p12 = scmp.ne.s32.totalorder (!%p1559_p8), %s1695_s19, 0 }
  0x3b   : > { %1448 = dma.done.wait (%p1702_p12), %s183_s22, 1024  }
  0x3c   : > { %1450 = vsyncadd (%p1702_p12), %s183_s22, 4294966272 }
  0x3d   : > { %1452 = dma.done.wait (%p1539_p1), [#allocation6], 8192  }
  0x3e   : > { %1454 = vsyncadd (%p1539_p1), [#allocation6], 4294959104  ;;  %v1277_v0 = vld [vmem:[#allocation5 + $0xf8] sm:$0xff]   ;;  %v1281_v4 = vld [vmem:[#allocation5 + $0xf0] sm:$0xff]   ;;  %s1036_s17 = sshll.u32 %s1620_s7, 3  ;;  %s1108_s19 = sshll.u32 %s1473_s12, 7 }
  0x3f   : > { %v1278_v1 = vld [vmem:[#allocation5 + $0x78] sm:$0xff]   ;;  %1112 = vmatprep.subr.bf16.mxu0 %v1277_v0  ;;  %v1282_v5 = vld [vmem:[#allocation5 + $0x70] sm:$0xff]   ;;  %v1285_v8 = vld [vmem:[#allocation5 + $0xe8] sm:$0xff]   ;;  %s210_s21 = scalar_lea.vmem [#allocation7], %s1036_s17  ;;  %s1647_s18 = scalar_lea.hbm %s1691_s2, %s1108_s19 }
  0x40   : > { %v1279_v2 = vld [vmem:[#allocation5 + $0xb8] sm:$0xff]   ;;  %1134 = vmatprep.subr.bf16.mxu1 %v1278_v1  ;;  %v1283_v6 = vld [vmem:[#allocation5 + $0xb0] sm:$0xff]   ;;  %v1286_v9 = vld [vmem:[#allocation5 + $0x68] sm:$0xff]   ;;  %s927_s24 = sshll.u32 %s210_s21, 4  ;;  %s912_s28 = scalar_lea.sflag [#allocation4], %s1620_s7  ;;  %s928_s24 = int_to_ptr.vmem [resolvable:$true] %s927_s24 }
  0x41   : > { %v1280_v3 = vld [vmem:[#allocation5 + $0x38] sm:$0xff]   ;;  %1113 = vmatpush3.bf16.msra.mxu0 %v1279_v2  ;;  %v1284_v7 = vld [vmem:[#allocation5 + $0x30] sm:$0xff]   ;;  %v1287_v10 = vld [vmem:[#allocation5 + $0xa8] sm:$0xff]   ;;  %s1397_s29 = scalar_lea.vmem %s928_s24, 128  ;;  %s1489_s30 = smov [#allocation7]  }
  0x42   : > { %1135 = vmatpush3.bf16.msra.mxu1 %v1280_v3  ;;  %1114 = vmatprep.subr.bf16.mxu0 %v1281_v4  ;;  %v1288_v11 = vld [vmem:[#allocation5 + $0x28] sm:$0xff]   ;;  %v1289_v12 = vld [vmem:[#allocation5 + $0xe0] sm:$0xff]   ;;  %v1293_v16 = vld [vmem:[#allocation5 + $0xd8] sm:$0xff]   ;;  %p1398_p1 = scmp.ne.s32.totalorder %s928_s24, %s1397_s29  ;;  %s1401_s3 = sshll.u32 %s1489_s30, 4  ;;  %s1402_s3 = int_to_ptr.vmem [resolvable:$false] %s1401_s3 }
  0x43   : > { %1136 = vmatprep.subr.bf16.mxu1 %v1282_v5  ;;  %v1290_v13 = vld [vmem:[#allocation5 + $0x60] sm:$0xff]   ;;  %v1294_v17 = vld [vmem:[#allocation5 + $0x58] sm:$0xff]   ;;  %v1297_v20 = vld [vmem:[#allocation5 + $0xd0] sm:$0xff]   ;;  %s1403_s12 = scalar_lea.vmem %s1402_s3, 256  ;;  %p1404_p0 = scmp.lt.s32.totalorder %s928_s24, %s1402_s3 }
  0x44   : > { %v1291_v14 = vld [vmem:[#allocation5 + $0xa0] sm:$0xff]   ;;  %v1295_v18 = vld [vmem:[#allocation5 + $0x98] sm:$0xff]   ;;  %v1298_v21 = vld [vmem:[#allocation5 + $0x50] sm:$0xff]   ;;  %p1399_p8 = pnand %p1398_p1, %p1592_p13  ;;  %p1405_p2 = scmp.lt.s32.totalorder %s1403_s12, %s1397_s29 }
  0x45   : > { %1115 = vmatpush3.bf16.msra.mxu0 %v1283_v6  ;;  %v1292_v15 = vld [vmem:[#allocation5 + $0x20] sm:$0xff]   ;;  %v1296_v19 = vld [vmem:[#allocation5 + $0x18] sm:$0xff]   ;;  %v1299_v22 = vld [vmem:[#allocation5 + $0x90] sm:$0xff]  }
  0x46   : > { %1137 = vmatpush3.bf16.msra.mxu1 %v1284_v7  ;;  %1116 = vmatprep.subr.bf16.mxu0 %v1285_v8  ;;  %v1300_v23 = vld [vmem:[#allocation5 + $0x10] sm:$0xff]   ;;  %v1301_v24 = vld [vmem:[#allocation5 + $0xc8] sm:$0xff]   ;;  %v1305_v28 = vld [vmem:[#allocation5 + $0xc0] sm:$0xff]   ;;  %p1400_p10 = pneg %p1399_p8  ;;  %p1406_p3 = por %p1405_p2, %p1404_p0 }
  0x47   : > { %1138 = vmatprep.subr.bf16.mxu1 %v1286_v9  ;;  %v1302_v25 = vld [vmem:[#allocation5 + $0x48] sm:$0xff]   ;;  %v1306_v29 = vld [vmem:[#allocation5 + $0x40] sm:$0xff]   ;;  %v1038_v32 = vld [vmem:[%s1624_s23 + $0x18] sm:$0xff] }
  0x48   : > { %v1303_v26 = vld [vmem:[#allocation5 + $0x88] sm:$0xff]   ;;  %v1307_v30 = vld [vmem:[#allocation5 + $0x80] sm:$0xff]   ;;  %v1037_v34 = vld [vmem:[%s1624_s23 + $0x10] sm:$0xff]  ;;  %v252_v35 = vpack.c.bf16 %v1038_v32, %v1038_v32  ;;  %p1407_p5 = pnand %p1406_p3, %p1400_p10 }
  0x49   : > { %1117 = vmatpush3.bf16.msra.mxu0 %v1287_v10  ;;  %v1304_v27 = vld [vmem:[#allocation5 + $0x8] sm:$0xff]   ;;  %v1308_v31 = vld [vmem:[#allocation5] sm:$0xff]   ;;  %v251_v37 = vpack.c.bf16 %v1037_v34, %v1037_v34  ;;  %v1309_v40 = vld [vmem:[#allocation5 + $0x178] sm:$0xff]  }
  0x4a   : > { %1139 = vmatpush3.bf16.msra.mxu1 %v1288_v11  ;;  %1118 = vmatprep.subr.bf16.mxu0 %v1289_v12  ;;  %v213_v33 = vld [vmem:[%s1624_s23 + $0x8] sm:$0xff]  ;;  %v212_v38 = vld [vmem:[%s1624_s23] sm:$0xff]  ;;  %v1310_v41 = vld [vmem:[#allocation5 + $0x1f8] sm:$0xff]  }
  0x4b   : > { %1140 = vmatprep.subr.bf16.mxu1 %v1290_v13  ;;  %v215_v36 = vpack.c.bf16 %v213_v33, %v213_v33  ;;  %v214_v39 = vpack.c.bf16 %v212_v38, %v212_v38  ;;  %414 = vmatprep.mubr.bf16.mxu0 %v252_v35  ;;  %v1311_v42 = vld [vmem:[#allocation5 + $0x138] sm:$0xff]   ;;  %v1313_v44 = vld [vmem:[#allocation5 + $0x170] sm:$0xff]   ;;  %v1317_v48 = vld [vmem:[#allocation5 + $0x168] sm:$0xff]  }
  0x4c   : > { %v1312_v43 = vld [vmem:[#allocation5 + $0x1b8] sm:$0xff]   ;;  %v1314_v45 = vld [vmem:[#allocation5 + $0x1f0] sm:$0xff]   ;;  %v1318_v49 = vld [vmem:[#allocation5 + $0x1e8] sm:$0xff]  }
  0x4d   : > { %1119 = vmatpush3.bf16.msra.mxu0 %v1291_v14  ;;  %550 = vmatprep.mubr.bf16.mxu1 %v215_v36  ;;  %v1315_v46 = vld [vmem:[#allocation5 + $0x130] sm:$0xff]   ;;  %v1319_v50 = vld [vmem:[#allocation5 + $0x128] sm:$0xff]   ;;  %v1321_v52 = vld [vmem:[#allocation5 + $0x160] sm:$0xff]  }
  0x4e   : > { %1141 = vmatpush3.bf16.msra.mxu1 %v1292_v15  ;;  %1120 = vmatprep.subr.bf16.mxu0 %v1293_v16  ;;  %v1316_v47 = vld [vmem:[#allocation5 + $0x1b0] sm:$0xff]   ;;  %v1320_v51 = vld [vmem:[#allocation5 + $0x1a8] sm:$0xff]   ;;  %v1322_v53 = vld [vmem:[#allocation5 + $0x1e0] sm:$0xff]  }
  0x4f   : > { %1142 = vmatprep.subr.bf16.mxu1 %v1294_v17  ;;  %v1323_v54 = vld [vmem:[#allocation5 + $0x120] sm:$0xff]   ;;  %v1325_v56 = vld [vmem:[#allocation5 + $0x158] sm:$0xff]   ;;  %v1329_v60 = vld [vmem:[#allocation5 + $0x150] sm:$0xff]  }
  0x50   : > { %v1324_v55 = vld [vmem:[#allocation5 + $0x1a0] sm:$0xff]   ;;  %v1326_v57 = vld [vmem:[#allocation5 + $0x1d8] sm:$0xff]   ;;  %v1330_v61 = vld [vmem:[#allocation5 + $0x1d0] sm:$0xff]  }
  0x51   : > { %1121 = vmatpush3.bf16.msra.mxu0 %v1295_v18  ;;  %v1327_v58 = vld [vmem:[#allocation5 + $0x118] sm:$0xff]   ;;  %v1331_v62 = vld [vmem:[#allocation5 + $0x110] sm:$0xff]   ;;  %v1333_v0 = vld [vmem:[#allocation5 + $0x148] sm:$0xff]  }
  0x52   : > { %1143 = vmatpush3.bf16.msra.mxu1 %v1296_v19  ;;  %1122 = vmatprep.subr.bf16.mxu0 %v1297_v20  ;;  %v1328_v59 = vld [vmem:[#allocation5 + $0x198] sm:$0xff]   ;;  %v1332_v63 = vld [vmem:[#allocation5 + $0x190] sm:$0xff]   ;;  %v1334_v1 = vld [vmem:[#allocation5 + $0x1c8] sm:$0xff]  }
  0x53   : > { %1144 = vmatprep.subr.bf16.mxu1 %v1298_v21  ;;  %v1335_v2 = vld [vmem:[#allocation5 + $0x108] sm:$0xff]   ;;  %v1337_v4 = vld [vmem:[#allocation5 + $0x140] sm:$0xff]   ;;  %v1090_v9 = vld [vmem:[%s1624_s23 + $0x38] sm:$0xff] }
  0x54   : > { %v1336_v3 = vld [vmem:[#allocation5 + $0x188] sm:$0xff]   ;;  %v1338_v5 = vld [vmem:[#allocation5 + $0x1c0] sm:$0xff]   ;;  %v737_v11 = vpack.c.bf16 %v1090_v9, %v1090_v9  ;;  %v1089_v13 = vld [vmem:[%s1624_s23 + $0x30] sm:$0xff] }
  0x55   : > { %1123 = vmatpush3.bf16.msra.mxu0 %v1299_v22  ;;  %v1339_v6 = vld [vmem:[#allocation5 + $0x100] sm:$0xff]   ;;  %v1072_v8 = vld [vmem:[%s1624_s23 + $0x28] sm:$0xff]  ;;  %v736_v15 = vpack.c.bf16 %v1089_v13, %v1089_v13 }
  0x56   : > { %1145 = vmatpush3.bf16.msra.mxu1 %v1300_v23  ;;  %1124 = vmatprep.subr.bf16.mxu0 %v1301_v24  ;;  %v1340_v7 = vld [vmem:[#allocation5 + $0x180] sm:$0xff]   ;;  %v562_v10 = vpack.c.bf16 %v1072_v8, %v1072_v8 }
  0x57   : > { %1146 = vmatprep.subr.bf16.mxu1 %v1302_v25  ;;  %v1071_v12 = vld [vmem:[%s1624_s23 + $0x20] sm:$0xff] }
  0x58   : > { %v561_v14 = vpack.c.bf16 %v1071_v12, %v1071_v12 }
  0x59   : > { %1125 = vmatpush3.bf16.msra.mxu0 %v1303_v26 }
  0x5a   : > { %1147 = vmatpush3.bf16.msra.mxu1 %v1304_v27  ;;  %1126 = vmatprep.subr.bf16.mxu0 %v1305_v28 }
  0x5b   : > { %1148 = vmatprep.subr.bf16.mxu1 %v1306_v29 }
  0x5d   : > { %1127 = vmatpush3.bf16.msra.mxu0 %v1307_v30 }
  0x5e   : > { %1149 = vmatpush3.bf16.msra.mxu1 %v1308_v31  ;;  %1156 = vmatprep.subr.bf16.mxu0 %v1309_v40 }
  0x5f   : > { %1178 = vmatprep.subr.bf16.mxu1 %v1310_v41 }
  0x60   : > { %415 = vmatmul.mubr.bf16.vlgmr.msra.gmra.mxu0 %v251_v37 }
  0x61   : > { %551 = vmatmul.mubr.bf16.vlgmr.msra.gmra.mxu1 %v214_v39  ;;  %1157 = vmatpush3.bf16.msra.mxu0 %v1311_v42 }
  0x62   : > { %1179 = vmatpush3.bf16.msra.mxu1 %v1312_v43  ;;  %1158 = vmatprep.subr.bf16.mxu0 %v1313_v44 }
  0x63   : > { %1180 = vmatprep.subr.bf16.mxu1 %v1314_v45  ;;  %724 = vmatprep.mubr.bf16.mxu0 %v562_v10 }
  0x64   : > { %899 = vmatprep.mubr.bf16.mxu1 %v737_v11 }
  0x65   : > { %1159 = vmatpush3.bf16.msra.mxu0 %v1315_v46 }
  0x66   : > { %1181 = vmatpush3.bf16.msra.mxu1 %v1316_v47  ;;  %1160 = vmatprep.subr.bf16.mxu0 %v1317_v48 }
  0x67   : > { %1182 = vmatprep.subr.bf16.mxu1 %v1318_v49 }
  0x69   : > { %1161 = vmatpush3.bf16.msra.mxu0 %v1319_v50 }
  0x6a   : > { %1183 = vmatpush3.bf16.msra.mxu1 %v1320_v51  ;;  %1162 = vmatprep.subr.bf16.mxu0 %v1321_v52 }
  0x6b   : > { %1184 = vmatprep.subr.bf16.mxu1 %v1322_v53 }
  0x6d   : > { %1163 = vmatpush3.bf16.msra.mxu0 %v1323_v54 }
  0x6e   : > { %1185 = vmatpush3.bf16.msra.mxu1 %v1324_v55  ;;  %1164 = vmatprep.subr.bf16.mxu0 %v1325_v56 }
  0x6f   : > { %1186 = vmatprep.subr.bf16.mxu1 %v1326_v57 }
  0x71   : > { %1165 = vmatpush3.bf16.msra.mxu0 %v1327_v58 }
  0x72   : > { %1187 = vmatpush3.bf16.msra.mxu1 %v1328_v59  ;;  %1166 = vmatprep.subr.bf16.mxu0 %v1329_v60 }
  0x73   : > { %1188 = vmatprep.subr.bf16.mxu1 %v1330_v61 }
  0x75   : > { %1167 = vmatpush3.bf16.msra.mxu0 %v1331_v62 }
  0x76   : > { %1189 = vmatpush3.bf16.msra.mxu1 %v1332_v63  ;;  %1168 = vmatprep.subr.bf16.mxu0 %v1333_v0 }
  0x77   : > { %1190 = vmatprep.subr.bf16.mxu1 %v1334_v1 }
  0x79   : > { %1169 = vmatpush3.bf16.msra.mxu0 %v1335_v2 }
  0x7a   : > { %1191 = vmatpush3.bf16.msra.mxu1 %v1336_v3  ;;  %1170 = vmatprep.subr.bf16.mxu0 %v1337_v4 }
  0x7b   : > { %1192 = vmatprep.subr.bf16.mxu1 %v1338_v5 }
  0x7d   : > { %1171 = vmatpush3.bf16.msra.mxu0 %v1339_v6 }
  0x7e   : > { %1193 = vmatpush3.bf16.msra.mxu1 %v1340_v7 }
  0x80   : > { %725 = vmatmul.mubr.bf16.vlgmr.msra.gmra.mxu0 %v561_v14 }
  0x81   : > { %900 = vmatmul.mubr.bf16.vlgmr.msra.gmra.mxu1 %v736_v15 }
 0x120   : > { %v1128_v16 = vpop.f32.mrf.mxu0 }
 0x121   : > { %v1150_v17 = vpop.f32.mrf.mxu1 }
 0x122   : > { %v1129_v18 = vpop.f32.mrf.mxu0 }
 0x123   : > { %v1151_v19 = vpop.f32.mrf.mxu1  ;;  %v1130_v24 = vadd.f32 %v1129_v18, %v1128_v16 }
 0x124   : > { %v1131_v20 = vpop.f32.mrf.mxu0  ;;  %v1152_v25 = vadd.f32 %v1151_v19, %v1150_v17 }
 0x125   : > { %v1153_v21 = vpop.f32.mrf.mxu1 }
 0x126   : > { %v1132_v22 = vpop.f32.mrf.mxu0  ;;  %v553_v29 = vadd.f32 %v1152_v25, %v1130_v24 }
 0x127   : > { %v1154_v23 = vpop.f32.mrf.mxu1 }
 0x140   : > { %v1172_v26 = vpop.f32.mrf.mxu0 }
 0x141   : > { %v1194_v27 = vpop.f32.mrf.mxu1 }
 0x142   : > { %v1173_v28 = vpop.f32.mrf.mxu0 }
 0x143   : > { %v1174_v30 = vadd.f32 %v1173_v28, %v1172_v26  ;;  %v1195_v31 = vpop.f32.mrf.mxu1 }
 0x144   : > { %v1175_v32 = vpop.f32.mrf.mxu0  ;;  %v1196_v34 = vadd.f32 %v1195_v31, %v1194_v27 }
 0x145   : > { %v732_v33 = vadd.f32 %v1174_v30, %v553_v29  ;;  %v1197_v35 = vpop.f32.mrf.mxu1 }
 0x146   : > { %v1176_v36 = vpop.f32.mrf.mxu0 }
 0x147   : > { %v907_v37 = vadd.f32 %v1196_v34, %v732_v33  ;;  %v1198_v38 = vpop.f32.mrf.mxu1 }
 0x149   : > { %v908_v39 = vmul.f32 1.442695, %v907_v37 }
 0x14b   : > { %1341 = vpow2.f32 %v908_v39 }
 0x158   : > { %v1342_v40 = vpop.eup %1341 }
 0x159   : > { %910 = vst [vmem:[%s210_s21] sm:$0xff] %v1342_v40 }
 0x15a   : > { %1410 = shalt.err (!%p1407_p5)
}
 0x15b   : > { %s1411_s6 = scalar_lea.hbm %s1647_s18, 128  ;;  %s1415_s7 = scalar_lea.hbm %s1691_s2, 256 }
 0x15c   : > { %p1412_p7 = scmp.ne.s32.totalorder %s1647_s18, %s1411_s6  ;;  %p1416_p9 = scmp.lt.s32.totalorder %s1647_s18, %s1691_s2 }
 0x15d   : > { %p1417_p11 = scmp.lt.s32.totalorder %s1415_s7, %s1411_s6 }
 0x15e   : > { %p1413_p6 = pnand %p1412_p7, %p1592_p13 }
 0x15f   : > { %p1418_p12 = por %p1417_p11, %p1416_p9 }
 0x160   : > { %p1414_p4 = pneg %p1413_p6 }
 0x162   : > { %p1419_p1 = pnand %p1418_p12, %p1414_p4 }
 0x164   : > { %1422 = shalt.err (!%p1419_p1)
}
 0x165   : > { %1206 = dma.vmem_to_hbm [thread:$0]  (%p1592_p13), %s928_s24, 128, %s1647_s18, %s912_s28  }
 0x166 PF: > { %s939_s23 = sand.u32 1, %s1461_s9   ;;  %p1703_p8 = scmp.ne.s32.totalorder %s1696_s20, 0 }
 0x167   : > { %p1704_p10 = scmp.ge.s32.totalorder %s1481_s14, 2  ;;  %s940_s17 = scalar_lea.sflag [#allocation4], %s939_s23 }
 0x169   : > { %p1217_p0 = pnand %p1704_p10, %p1703_p8 }
 0x16b   : > { %p1218_p2 = pneg %p1217_p0 }
 0x16d   : > { %1456 = dma.done.wait (%p1218_p2), %s940_s17, 128  }
 0x16e   : > { %1458 = vsyncadd (%p1218_p2), %s940_s17, 4294967168  ;;  %s19_s14 = sadd.s32 1, %s1481_s14   ;;  %s1705_s9 = smov %s1465_s10 }
 0x16f   : > { %p16_p3 = scmp.ge.s32.totalorder %s19_s14, 4   ;;  %s1706_s10 = smov %s1469_s11 }
 0x170   : > { %s1707_s11 = smov %s1601_s15  ;;  %s1708_s12 = smov %s1477_s13 }
 0x171   : > { %s1709_s13 = smov %s1711_s25  ;;  %18 = sbr.rel (!%p16_p3) target bundleno = 7 (0x7), region = 84 }
 0x176   :  { %945 = vsyncpa [#allocation3], 1 }
 0x177   :  { %947 = vsyncpa [#allocation3 + $0x1], 1 }
 0x178   :  { %948 = vsyncpa [#allocation6], 1 }
 0x179   :  { %949 = vsyncpa [#allocation4], 1 }
 0x17a   :  { %951 = vsyncpa [#allocation4 + $0x1], 1 }

</bundles_post_ra>
